<compile_context>
chip_gen: v6e
topology: v6e:2x2x1
jax: 0.10.0
libtpu: 0.0.40
codegen_flags: <defaults>
</compile_context>

<pallas_src>
import functools

import jax
import jax.numpy as jnp
from jax import lax
from jax.experimental import pallas as pl
from jax.experimental.pallas import tpu as pltpu


# ---------------------------------------------------------------------------
# Kernels: pure VPU broadcast bias-adds (f32 accumulate, native-dtype I/O)
# ---------------------------------------------------------------------------
def _bias_add_kernel_hwt(scores_ref, rel_h_ref, rel_w_ref, rel_t_ref, out_ref):
    # scores/out: (tQs, Qh, Qw, TK); rel_h: (Qh, TK); rel_w: (Qw, TK); rel_t: (tQs, TK)
    s = scores_ref[...].astype(jnp.float32)
    s = s + rel_h_ref[...][None, :, None, :]
    s = s + rel_w_ref[...][None, None, :, :]
    s = s + rel_t_ref[...][:, None, None, :]
    out_ref[...] = s.astype(out_ref.dtype)


def _bias_add_kernel_hw_t(scores_ref, rel_hw_ref, rel_t_ref, out_ref):
    # scores/out: (tQs, Qh, TKl); rel_hw: (Qh, TKl); rel_t: (tQs, TKl)
    s = scores_ref[...].astype(jnp.float32)
    s = s + rel_hw_ref[...][None, :, :]
    s = s + rel_t_ref[...][:, None, :]
    out_ref[...] = s.astype(out_ref.dtype)


# ---------------------------------------------------------------------------
# Distance indices + embedding gathers (index-only / tiny compute)
# ---------------------------------------------------------------------------
def _dist_indices(q_n, k_n):
    q_ratio = int(round(max(k_n / q_n, 1.0)))
    k_ratio = int(round(max(q_n / k_n, 1.0)))
    d = (jnp.arange(k_n)[:, None] * k_ratio
         - jnp.arange(q_n)[None, :] * q_ratio
         + (q_n - 1) * q_ratio)
    return d.astype(jnp.int32)


def _gather_embeddings(height_emb, width_emb, time_emb, Qs, Qh, Qw, Ks, Kh, Kw):
    Rh = height_emb[_dist_indices(Qh, Kh)]   # (Kh, Qh, C)
    Rw = width_emb[_dist_indices(Qw, Kw)]    # (Kw, Qw, C)
    Rt = time_emb[_dist_indices(Qs, Ks)]     # (Ks, Qs, C)
    return Rh, Rw, Rt
    # TODO(synk): nn.Dropout layers are identity at drop_rate=0.0 (eval); not lowered.


# ---------------------------------------------------------------------------
# Generation-aware VMEM budgeting and tile selection
# ---------------------------------------------------------------------------
def _pad_up(n, m):
    return ((n + m - 1) // m) * m


def _vmem_budgets():
    try:
        cap = int(pltpu.get_tpu_info().vmem_capacity_bytes)
    except Exception:                       # conservative fallback: v7x (64 MiB)
        cap = 64 * 1024 * 1024
    limit_cap = (70 * cap) // 100           # never request more than ~70% physical
    soft = min(32 * 1024 * 1024, (35 * cap) // 100)   # ~22 MiB on v7x, 32 MiB v5e/v6e
    hard = max(soft, limit_cap - (8 << 20))
    return soft, hard, limit_cap


def _choose_tiles(Qs, mid_prod, sub, lane_full, scores_itemsize,
                  fixed_bias_rows, soft_budget, hard_cap):
    """Pick (tQs, TK) for a scores block (tQs, <mid>, sub, TK).

    rel_t's block is (tQs, TK), so tQs must be Qs itself or a multiple of 8.
    `need` accounts for sublane/lane padding and pipeline double buffering.
    """
    if lane_full % 128 == 0:
        tk_cands = sorted({t for t in (lane_full, 4096, 2048, 1024, 512, 256, 128)
                           if t <= lane_full and lane_full % t == 0}, reverse=True)
    else:
        tk_cands = [lane_full]              # full-dim block is always legal
    tqs_cands = sorted({Qs} | {d for d in range(8, Qs + 1, 8) if Qs % d == 0},
                       reverse=True)

    def need_bytes(tqs, tk):
        s_blk = tqs * mid_prod * _pad_up(sub, 8) * _pad_up(tk, 128) * scores_itemsize
        b_rows = sum(_pad_up(r, 8) for r in fixed_bias_rows) + _pad_up(tqs, 8)
        b_blk = b_rows * _pad_up(tk, 128) * 4
        return 2 * (2 * s_blk + b_blk)      # scores in + out, biases; x2 buffers

    for cap in (soft_budget, hard_cap):
        for tk in tk_cands:                 # lane-dense tiles first
            for tqs in tqs_cands:           # then the largest qs tile
                n = need_bytes(tqs, tk)
                if n <= cap:
                    return tqs, tk, n
    raise ValueError(
        "relative_positional_embedding_2d_key: no tiling fits VMEM "
        f"(Qs={Qs}, sublane={sub}, lane={lane_full}, itemsize={scores_itemsize}).")


# ---------------------------------------------------------------------------
# Wrapper
# ---------------------------------------------------------------------------
def relative_positional_embedding_2d_key(key, scores, height_emb, width_emb,
                                         time_emb, *, query_shape, memory_shape,
                                         query_dim, heads):
    Qs, Qh, Qw, _ = query_shape
    Ks, Kh, Kw, _ = memory_shape
    C = query_dim
    Lk = Ks * Kh * Kw
    Lq = Qs * Qh * Qw

    out_dtype = scores.dtype
    s_isz = jnp.dtype(out_dtype).itemsize

    Rh, Rw, Rt = _gather_embeddings(height_emb, width_emb, time_emb,
                                    Qs, Qh, Qw, Ks, Kh, Kw)

    # --- hoisted channel contractions (tiny; left to XLA, f32) --------------
    keyr = key.reshape(-1, Ks, Kh, Kw, C).astype(jnp.float32)
    BN = keyr.shape[0]
    hi = lax.Precision.HIGHEST
    rel_h = jnp.einsum('hqc,bshwc->bqshw', Rh.astype(jnp.float32), keyr,
                       precision=hi).reshape(BN, Qh, Lk)
    rel_w = jnp.einsum('wqc,bshwc->bqshw', Rw.astype(jnp.float32), keyr,
                       precision=hi).reshape(BN, Qw, Lk)
    rel_t = jnp.einsum('sqc,bshwc->bqshw', Rt.astype(jnp.float32), keyr,
                       precision=hi).reshape(BN, Qs, Lk)

    soft_budget, hard_cap, limit_cap = _vmem_budgets()

    if Lk >= 128:
        # ---- general path: lane axis = Lk, all three biases folded in-kernel
        scores_v = scores.reshape(BN, Qs, Qh, Qw, Lk)            # free reshape
        tQs, TK, need = _choose_tiles(Qs, Qh, Qw, Lk, s_isz, [Qh, Qw],
                                      soft_budget, hard_cap)
        grid = (BN, Lk // TK, Qs // tQs)
        kernel = _bias_add_kernel_hwt
        operands = (scores_v, rel_h, rel_w, rel_t)
        in_specs = [
            pl.BlockSpec((pl.Squeezed(), tQs, Qh, Qw, TK),
                         lambda b, j, i: (b, i, 0, 0, j)),
            pl.BlockSpec((pl.Squeezed(), Qh, TK), lambda b, j, i: (b, 0, j)),
            pl.BlockSpec((pl.Squeezed(), Qw, TK), lambda b, j, i: (b, 0, j)),
            pl.BlockSpec((pl.Squeezed(), tQs, TK), lambda b, j, i: (b, i, j)),
        ]
        out_spec = pl.BlockSpec((pl.Squeezed(), tQs, Qh, Qw, TK),
                                lambda b, j, i: (b, i, 0, 0, j))
        out_shape = jax.ShapeDtypeStruct((BN, Qs, Qh, Qw, Lk), out_dtype)
        bias_bytes = 4 * BN * Lk * (Qh + Qw + Qs)
        flops = 3 * BN * Lq * Lk
    else:
        # ---- small-Lk path (demo regime): fold Qw onto the lane axis --------
        Lw = Qw * Lk
        scores_v = scores.reshape(BN, Qs, Qh, Lw)                # free reshape
        rel_hw = (rel_h[:, :, None, :] + rel_w[:, None, :, :]).reshape(BN, Qh, Lw)
        rel_tl = jnp.broadcast_to(rel_t[:, :, None, :],
                                  (BN, Qs, Qw, Lk)).reshape(BN, Qs, Lw)
        tQs, TK, need = _choose_tiles(Qs, 1, Qh, Lw, s_isz, [Qh],
                                      soft_budget, hard_cap)
        grid = (BN, Lw // TK, Qs // tQs)
        kernel = _bias_add_kernel_hw_t
        operands = (scores_v, rel_hw, rel_tl)
        in_specs = [
            pl.BlockSpec((pl.Squeezed(), tQs, Qh, TK),
                         lambda b, j, i: (b, i, 0, j)),
            pl.BlockSpec((pl.Squeezed(), Qh, TK), lambda b, j, i: (b, 0, j)),
            pl.BlockSpec((pl.Squeezed(), tQs, TK), lambda b, j, i: (b, i, j)),
        ]
        out_spec = pl.BlockSpec((pl.Squeezed(), tQs, Qh, TK),
                                lambda b, j, i: (b, i, 0, j))
        out_shape = jax.ShapeDtypeStruct((BN, Qs, Qh, Lw), out_dtype)
        bias_bytes = 4 * BN * Lw * (Qh + Qs)
        flops = 2 * BN * Lq * Lk

    vmem_limit = int(min(limit_cap, max(32 * 1024 * 1024, need + (8 << 20))))

    out = pl.pallas_call(
        kernel,
        out_shape=out_shape,
        grid_spec=pltpu.PrefetchScalarGridSpec(
            num_scalar_prefetch=0,
            # lk-tiles outer, qs-tiles inner: rel_h/rel_w (rel_hw) block indices
            # are constant across the inner axis, so they are not re-fetched.
            grid=grid,
            in_specs=in_specs,
            out_specs=out_spec),
        input_output_aliases={0: 0},         # true in-place with donated scores
        compiler_params=pltpu.CompilerParams(
            dimension_semantics=("parallel", "parallel", "arbitrary"),
            vmem_limit_bytes=vmem_limit),
        cost_estimate=pl.CostEstimate(
            flops=flops, transcendentals=0,
            bytes_accessed=2 * s_isz * BN * Lq * Lk + bias_bytes),
    )(*operands)

    return out.reshape(-1, heads, Lq, Lk)


# ---------------------------------------------------------------------------
# Pure-JAX reference (direct transcription of the torch forward)
# ---------------------------------------------------------------------------
def _reference(key, scores, height_emb, width_emb, time_emb,
               query_shape, memory_shape, query_dim, heads):
    Qs, Qh, Qw, _ = query_shape
    Ks, Kh, Kw, _ = memory_shape
    hi = lax.Precision.HIGHEST
    Rh, Rw, Rt = _gather_embeddings(height_emb, width_emb, time_emb,
                                    Qs, Qh, Qw, Ks, Kh, Kw)
    keyr = key.reshape(-1, heads, Ks, Kh, Kw, query_dim)
    rel_h = jnp.einsum('hqc,bNshwc->bNqshw', Rh, keyr, precision=hi)
    rel_w = jnp.einsum('wqc,bNshwc->bNqshw', Rw, keyr, precision=hi)
    rel_t = jnp.einsum('sqc,bNshwc->bNqshw', Rt, keyr, precision=hi)
    sc = scores.reshape(-1, heads, Qs, Qh, Qw, Ks, Kh, Kw)
    sc = sc + rel_h[:, :, None, :, None, :, :, :]
    sc = sc + rel_w[:, :, None, None, :, :, :, :]
    sc = sc + rel_t[:, :, :, None, None, :, :, :]
    return sc.reshape(-1, heads, Qs * Qh * Qw, Ks * Kh * Kw)


# ---------------------------------------------------------------------------
# Demo / self-test
# ---------------------------------------------------------------------------
if __name__ == "__main__":
    def run_case(name, B, heads, query_shape, memory_shape, query_dim, seed=0):
        Qs, Qh, Qw, _ = query_shape
        Ks, Kh, Kw, _ = memory_shape
        Lq, Lk = Qs * Qh * Qw, Ks * Kh * Kw
        max_h = max(Qh, Kh) - 1
        max_w = max(Qw, Kw) - 1
        max_t = max(Qs, Ks) - 1

        root = jax.random.PRNGKey(seed)
        k_he, k_we, k_te, k_key, k_sc = jax.random.split(root, 5)
        height_emb = jax.random.normal(k_he, (2 * max_h + 1, query_dim), jnp.float32)
        width_emb = jax.random.normal(k_we, (2 * max_w + 1, query_dim), jnp.float32)
        time_emb = jax.random.normal(k_te, (2 * max_t + 1, query_dim), jnp.float32)
        key = jax.random.normal(k_key, (B, heads, Ks, Kh, Kw, query_dim), jnp.float32)
        scores = jax.random.normal(k_sc, (B, heads, Lq, Lk), jnp.float32)

        # Reference first (scores is donated to the kernel call below).
        ref = _reference(key, scores, height_emb, width_emb, time_emb,
                         query_shape, memory_shape, query_dim, heads)
        ref = jax.block_until_ready(ref)

        fwd = jax.jit(
            functools.partial(relative_positional_embedding_2d_key,
                              query_shape=query_shape, memory_shape=memory_shape,
                              query_dim=query_dim, heads=heads),
            donate_argnums=(1,))           # donate scores -> real in-place alias
        out = fwd(key, scores, height_emb, width_emb, time_emb)
        out = jax.block_until_ready(out)

        assert out.shape == (B, heads, Lq, Lk), (name, out.shape)
        assert jnp.allclose(out, ref, rtol=1e-5, atol=1e-5), f"{name}: mismatch"

    # Small-Lk path (Lk = 32 < 128): Qw folded onto the lane axis (lane = 128).
    run_case("small_lk", B=2, heads=2,
             query_shape=(2, 4, 4, 8), memory_shape=(2, 4, 4, 8), query_dim=8)
    # General path (Lk = 128): in-kernel rel_h/rel_w/rel_t broadcast add.
    run_case("lane_dense", B=2, heads=2,
             query_shape=(2, 4, 4, 8), memory_shape=(2, 8, 8, 8), query_dim=8)

    print("KERNEL_OK")
</pallas_src>

<mosaic_0001>
module attributes {stable_mosaic.version = 11 : i64} {
  func.func @_bias_add_kernel_hw_t(%arg0: i32, %arg1: i32, %arg2: i32, %arg3: memref<1x2x4x128xf32, #tpu.memory_space<vmem>>, %arg4: memref<1x4x128xf32, #tpu.memory_space<vmem>>, %arg5: memref<1x2x128xf32, #tpu.memory_space<vmem>>, %arg6: memref<1x2x4x128xf32, #tpu.memory_space<vmem>>) attributes {dimension_semantics = [#tpu.dimension_semantics<parallel>, #tpu.dimension_semantics<parallel>, #tpu.dimension_semantics<arbitrary>], iteration_bounds = array<i64: 4, 1, 1>, scalar_prefetch = 0 : i64, scratch_operands = 0 : i64, tpu.core_type = #tpu.core_type<tc>, window_params = [{transform_indices = @transform_0, window_bounds = array<i64: 1, 2, 4, 128>}, {transform_indices = @transform_1, window_bounds = array<i64: 1, 4, 128>}, {transform_indices = @transform_2, window_bounds = array<i64: 1, 2, 128>}, {transform_indices = @transform_3, window_bounds = array<i64: 1, 2, 4, 128>}]} {
    %c0 = arith.constant 0 : index
    %c0_0 = arith.constant 0 : index
    %c0_1 = arith.constant 0 : index
    %c0_2 = arith.constant 0 : index
    %0 = vector.load %arg3[%c0, %c0_0, %c0_1, %c0_2] : memref<1x2x4x128xf32, #tpu.memory_space<vmem>>, vector<1x2x4x128xf32>
    %1 = vector.shape_cast %0 : vector<1x2x4x128xf32> to vector<2x4x128xf32>
    %c0_3 = arith.constant 0 : index
    %c0_4 = arith.constant 0 : index
    %c0_5 = arith.constant 0 : index
    %2 = vector.load %arg4[%c0_3, %c0_4, %c0_5] : memref<1x4x128xf32, #tpu.memory_space<vmem>>, vector<1x4x128xf32>
    %3 = vector.shape_cast %2 : vector<1x4x128xf32> to vector<4x128xf32>
    %4 = vector.shape_cast %3 : vector<4x128xf32> to vector<1x4x128xf32>
    %5 = vector.broadcast %4 : vector<1x4x128xf32> to vector<2x4x128xf32>
    %6 = arith.addf %1, %5 : vector<2x4x128xf32>
    %c0_6 = arith.constant 0 : index
    %c0_7 = arith.constant 0 : index
    %c0_8 = arith.constant 0 : index
    %7 = vector.load %arg5[%c0_6, %c0_7, %c0_8] : memref<1x2x128xf32, #tpu.memory_space<vmem>>, vector<1x2x128xf32>
    %8 = vector.shape_cast %7 : vector<1x2x128xf32> to vector<2x128xf32>
    %9 = vector.shape_cast %8 : vector<2x128xf32> to vector<2x1x128xf32>
    %10 = vector.broadcast %9 : vector<2x1x128xf32> to vector<2x4x128xf32>
    %11 = arith.addf %6, %10 : vector<2x4x128xf32>
    %c0_9 = arith.constant 0 : index
    %c0_10 = arith.constant 0 : index
    %c0_11 = arith.constant 0 : index
    %c0_12 = arith.constant 0 : index
    %12 = vector.load %arg6[%c0_9, %c0_10, %c0_11, %c0_12] : memref<1x2x4x128xf32, #tpu.memory_space<vmem>>, vector<1x2x4x128xf32>
    %13 = vector.shape_cast %12 : vector<1x2x4x128xf32> to vector<2x4x128xf32>
    %14 = vector.shape_cast %11 : vector<2x4x128xf32> to vector<1x2x4x128xf32>
    tpu.vector_store %arg6[%c0_9, %c0_10, %c0_11, %c0_12], %14 {strides = array<i32>} : memref<1x2x4x128xf32, #tpu.memory_space<vmem>>, vector<1x2x4x128xf32>,
    return
  }
  func.func @transform_0(%arg0: i32, %arg1: i32, %arg2: i32) -> (i32, i32, i32, i32) {
    %c0_i32 = arith.constant 0 : i32
    %c0_i32_0 = arith.constant 0 : i32
    return %arg0, %arg2, %c0_i32, %arg1 : i32, i32, i32, i32
  }
  func.func @transform_1(%arg0: i32, %arg1: i32, %arg2: i32) -> (i32, i32, i32) {
    %c0_i32 = arith.constant 0 : i32
    %c0_i32_0 = arith.constant 0 : i32
    return %arg0, %c0_i32, %arg1 : i32, i32, i32
  }
  func.func @transform_2(%arg0: i32, %arg1: i32, %arg2: i32) -> (i32, i32, i32) {
    %c0_i32 = arith.constant 0 : i32
    return %arg0, %arg2, %arg1 : i32, i32, i32
  }
  func.func @transform_3(%arg0: i32, %arg1: i32, %arg2: i32) -> (i32, i32, i32, i32) {
    %c0_i32 = arith.constant 0 : i32
    %c0_i32_0 = arith.constant 0 : i32
    return %arg0, %arg2, %c0_i32, %arg1 : i32, i32, i32, i32
  }
}

</mosaic_0001>

<bundles_post_ra>
// kernel: relative_positional_embedding_2d_key.1
= control target key start
LH: loop header
LB: loop body
LE: loop exit
PB: predicated region body
PF: predicated region fallthrough
CT: control target
= control target key end

     0   :  { %s568_s12 = smov 0   ;;  %s570_s13 = smov 0   ;;  %s607_s0 = inlined_call_operand.vmem [shape: f32[4,2,4,128], index: 0, kind: input, shape index: {}, may-alias: {0,3}]   ;;  %s608_s1 = inlined_call_operand.vmem [shape: f32[4,4,128], index: 1, kind: input, shape index: {}]   ;;  %s609_s2 = inlined_call_operand.vmem [shape: f32[4,2,128], index: 2, kind: input, shape index: {}]   ;;  %s610_s3 = inlined_call_operand.vmem [shape: f32[4,2,4,128], index: 3, kind: output, shape index: {}, may-alias: {0,3}]  }
   0x1   :  { %s572_s14 = smov 0  }
   0x2 LB: > { %s32_s15 = sadd.s32 1, %s541_s13  ;;  %p486_p0 = scmp.ge.s32.totalorder %s545_s14, 1  ;;  %s545_s14 = sphi %s572_s14, %s13_s14   ;;  %s541_s13 = sphi %s570_s13, %s612_s13   ;;  %s537_s12 = sphi %s568_s12, %s611_s12  }
   0x3   : > { %p34_p1 = scmp.ge.s32.totalorder %s32_s15, 4  ;;  %p205_p2 = scmp.lt.s32.totalorder %s545_s14, 5 }
   0x5   : > { %s614_s15 = smov (%p34_p1, %s32_s15), 0  ;;  %p206_p3 = pnand %p486_p0, %p205_p2 }
   0x6   : > { %p261_p4 = scmp.lt.s32.totalorder (!%p206_p3), %s537_s12, 3 }
   0x7   : > { %209 = sbr.rel (%p206_p3) target bundleno = 27 (0x1b), region = 32 }
   0xc   : > { %v321_v0 = vlaneseq  ;;  %v547_v1 = vmov 1966171168   ;;  %s616_s12 = smov (!%p261_p4, %s537_s12), 3 }
   0xd   : > { %v319_v2 = vunpack.c.l.s4 %v547_v1  ;;  %s496_s16 = sshll.u32 %s616_s12, 3  ;;  %s489_s17 = sshll.u32 %s616_s12, 2 }
   0xe   : > { %v322_v3 = vshrl.u32 %v321_v0, 7  ;;  %s271_s20 = scalar_lea.vmem %s607_s0, %s496_s16  ;;  %s279_s23 = scalar_lea.vmem %s608_s1, %s489_s17 }
   0xf   : > { %v320_v4 = vunpack.c.0.s8 %v319_v2  ;;  %s490_s24 = sshll.u32 %s616_s12, 1  ;;  %v303_v6 = vld [vmem:[%s271_s20] sm:$0xf]  ;;  %v304_v9 = vld [vmem:[%s271_s20 + $0x4] sm:$0xf]  ;;  %s301_s30 = scalar_lea.vmem %s610_s3, %s496_s16 }
  0x10   : > { %s289_s27 = scalar_lea.vmem %s609_s2, %s490_s24  ;;  %v305_v7 = vld [vmem:[%s279_s23] sm:$0xf]  ;;  %v334_v8 = vsub.s32 0, %v322_v3 }
  0x11   : > { %v323_v5 = vsub.s32 %v320_v4, %v322_v3  ;;  %v493_v10 = vld.sshfl [vmem:[%s289_s27] sm:$0x11 pattern:$0x75316420]  ;;  %v306_v11 = vadd.f32 %v305_v7, %v303_v6  ;;  %v307_v14 = vadd.f32 %v305_v7, %v304_v9 }
  0x12   : > { %v317_v13 = vcombine.high %v493_v10, %v493_v10 }
  0x13   : > { %v324_v12 = vrot.slane %v493_v10, %v323_v5 }
  0x14   : > { %v331_v16 = vrot.slane %v317_v13, %v323_v5 }
  0x15   : > { %v335_v15 = vrot.slane %v324_v12, %v334_v8 }
  0x16   : > { %v339_v18 = vrot.slane %v331_v16, %v334_v8 }
  0x17   : > { %v342_v17 = vadd.f32 %v335_v15, %v306_v11 }
  0x18   : > { %v343_v19 = vadd.f32 %v339_v18, %v307_v14 }
  0x19   : > { %344 = vst [vmem:[%s301_s30] sm:$0xf] %v342_v17 }
  0x1a   : > { %345 = vst [vmem:[%s301_s30 + $0x4] sm:$0xf] %v343_v19 }
  0x1b PF: > { %s13_s14 = sadd.s32 1, %s545_s14   ;;  %s611_s12 = smov %s541_s13 }
  0x1c   : > { %p10_p5 = scmp.ge.s32.totalorder %s13_s14, 6   ;;  %s612_s13 = smov %s614_s15 }
  0x1e   :  { %12 = sbr.rel (!%p10_p5) target bundleno = 2 (0x2), region = 68 }

</bundles_post_ra>
